<compile_context>
chip_gen: v5e
topology: v5e:2x2
jax: 0.10.0
libtpu: 0.0.40
codegen_flags: <defaults>
</compile_context>

<pallas_src>
import functools

import jax
import jax.numpy as jnp
from jax.experimental import pallas as pl
from jax.experimental.pallas import tpu as pltpu


def _round_up(x, m):
    return ((x + m - 1) // m) * m


# ----------------------------------------------------------------------------
# Kernel: one fused MXU matmul + f32 bias + gate elementwise math for one
# (batch, hidden) tile.  Gate columns are interleaved per hidden tile as
# [f | i | g], each `tn` lanes wide (tn multiple of 128 -> lane-aligned slices
# and a lane-dense output store).
# ----------------------------------------------------------------------------
def _lstm_gates_kernel(xh_ref, w_ref, b_ref, c0_ref, c1_ref, *, tn):
    # xh_ref: (bt, Kp) cdt, w_ref: (Kp, 3*tn) cdt, b_ref: (1, 3*tn) f32,
    # c0_ref: (bt, tn) c0-dtype, c1_ref: (bt, tn) out-dtype.
    gates = jnp.dot(xh_ref[...], w_ref[...], preferred_element_type=jnp.float32)
    gates = gates + b_ref[...]                       # f32 bias after the dot

    f = gates[:, 0 * tn:1 * tn]
    i = gates[:, 1 * tn:2 * tn]
    g = gates[:, 2 * tn:3 * tn]

    # Gate math in f32 (safe on v5e's no-bf16 VPU/EUP).
    c0 = c0_ref[...].astype(jnp.float32)
    c1 = jax.nn.sigmoid(f) * c0 + jax.nn.sigmoid(i) * jnp.tanh(g)
    c1_ref[...] = c1.astype(c1_ref.dtype)


# ----------------------------------------------------------------------------
# One-time parameter packing: stack W_ih/W_hh, pad, interleave gate columns
# per hidden tile, cast to the MXU compute dtype; keep bias in f32.
# ----------------------------------------------------------------------------
def pack_params(weight_ih, weight_hh, bias=None, compute_dtype=jnp.bfloat16,
                hidden_tile=512):
    input_size, three_h = weight_ih.shape
    hidden_size = weight_hh.shape[0]
    assert three_h == 3 * hidden_size

    H = hidden_size
    K = input_size + H                       # fused contraction dim
    Hp = _round_up(H, 128)                   # lane-aligned hidden size
    Kp = _round_up(K, 128)                   # dense lanes for xh / sublanes for w

    # Per-gate hidden-tile width: largest multiple of 128 <= hidden_tile that
    # divides Hp (degenerates to Hp itself for small H).
    tn = 128
    for cand in range(max(128, min(Hp, hidden_tile)), 127, -128):
        if Hp % cand == 0:
            tn = cand
            break
    nj = Hp // tn

    if bias is None:
        bias = jnp.zeros((3 * H,), jnp.float32)
    bias = bias.astype(jnp.float32)

    w_stack = jnp.concatenate(
        [weight_ih.astype(jnp.float32), weight_hh.astype(jnp.float32)], axis=0)

    # Gate-interleaved column layout: hidden tile j occupies columns
    # [j*3*tn, (j+1)*3*tn) as [f_j | i_j | g_j].
    w = jnp.zeros((Kp, 3 * Hp), jnp.float32)
    b = jnp.zeros((1, 3 * Hp), jnp.float32)
    for j in range(nj):
        lo = j * tn
        width = min(H, lo + tn) - lo
        if width <= 0:
            continue
        for gate in range(3):
            col0 = j * 3 * tn + gate * tn
            w = w.at[:K, col0:col0 + width].set(
                w_stack[:, gate * H + lo:gate * H + lo + width])
            b = b.at[0, col0:col0 + width].set(
                bias[gate * H + lo:gate * H + lo + width])

    return dict(
        w=w.astype(compute_dtype),           # MXU-input dtype (bf16 default)
        b=b,                                 # f32 bias, added after the dot
        input_size=input_size, hidden_size=H,
        K=K, Kp=Kp, Hp=Hp, tn=tn, nj=nj,
        compute_dtype=compute_dtype,
    )


# ----------------------------------------------------------------------------
# Wrapper
# ----------------------------------------------------------------------------
def word_lstm_cell(input_, h_0, c_0, params, *, batch_tile=256):
    if input_.ndim == 1:
        input_ = input_[None, :]

    H = params["hidden_size"]
    Hp, Kp, K = params["Hp"], params["Kp"], params["K"]
    tn, nj = params["tn"], params["nj"]
    w, b_packed = params["w"], params["b"]
    cdt = params["compute_dtype"]
    cdt_bytes = jnp.dtype(cdt).itemsize
    out_dtype = c_0.dtype
    c0_bytes = jnp.dtype(c_0.dtype).itemsize
    out_bytes = jnp.dtype(out_dtype).itemsize

    B = h_0.shape[0]
    sub = 8 * max(1, 4 // cdt_bytes)          # packed sublane rows (16 @ bf16)
    bt = min(_round_up(B, sub), _round_up(batch_tile, sub))
    Bp = _round_up(B, bt)
    nb = Bp // bt

    # Fused activation [x | h0]: built directly in compute dtype, single pad
    # (no f32 zeros+scatter intermediate).  Bias is a separate f32 input.
    xh = jnp.concatenate([input_.astype(cdt), h_0.astype(cdt)], axis=1)
    xh = jnp.pad(xh, ((0, Bp - B), (0, Kp - K)))
    c0p = jnp.pad(c_0, ((0, Bp - B), (0, Hp - H)))

    grid = (nj, nb)   # hidden tiles outer -> weight block constant over batch

    flops = 2 * Bp * Kp * 3 * Hp + 10 * Bp * Hp
    transcendentals = 3 * Bp * Hp
    bytes_accessed = int(Bp * Kp * cdt_bytes + Kp * 3 * Hp * cdt_bytes
                         + 3 * Hp * 4 + Bp * Hp * (c0_bytes + out_bytes))

    # Generation-dependent VMEM budget (~96 MiB v5e/v6e, ~48 MiB v7x).
    try:
        vmem_cap = int(getattr(pltpu.get_tpu_info(), "vmem_capacity_bytes",
                               64 << 20))
    except Exception:
        vmem_cap = 64 << 20

    def make_call(single_buffer_weight):
        w_bufs = 1 if single_buffer_weight else 2
        vmem_need = int(2 * bt * Kp * cdt_bytes              # xh (double buf)
                        + w_bufs * Kp * 3 * tn * cdt_bytes   # weight block
                        + 2 * 8 * 3 * tn * 4                 # bias block
                        + 2 * bt * tn * (c0_bytes + out_bytes)
                        + 2 * bt * 3 * tn * 4                # f32 gate temps
                        + (2 << 20))
        vmem_limit = int(min(max(vmem_need, 16 << 20), (vmem_cap * 3) // 4))

        w_spec_kwargs = {}
        if single_buffer_weight:
            # Constant index_map across the whole grid -> one resident copy.
            w_spec_kwargs["pipeline_mode"] = pl.Buffered(1)

        return pl.pallas_call(
            functools.partial(_lstm_gates_kernel, tn=tn),
            out_shape=jax.ShapeDtypeStruct((Bp, Hp), out_dtype),
            grid=grid,
            in_specs=[
                pl.BlockSpec((bt, Kp), lambda j, b: (b, 0)),
                pl.BlockSpec((Kp, 3 * tn), lambda j, b: (0, j), **w_spec_kwargs),
                pl.BlockSpec((1, 3 * tn), lambda j, b: (0, j)),
                pl.BlockSpec((bt, tn), lambda j, b: (b, j)),
            ],
            out_specs=pl.BlockSpec((bt, tn), lambda j, b: (b, j)),
            compiler_params=pltpu.CompilerParams(
                dimension_semantics=("parallel", "parallel"),
                vmem_limit_bytes=vmem_limit,
            ),
            cost_estimate=pl.CostEstimate(
                flops=int(flops),
                transcendentals=int(transcendentals),
                bytes_accessed=bytes_accessed,
            ),
        )

    # Single-buffer the weight only when its block index is constant over the
    # WHOLE grid (one hidden tile); fall back if Buffered(1) is unsupported.
    use_single_buffer = (nj == 1) and hasattr(pl, "Buffered")
    try:
        out = make_call(use_single_buffer)(xh, w, b_packed, c0p)
    except Exception:
        if not use_single_buffer:
            raise
        out = make_call(False)(xh, w, b_packed, c0p)

    return out[:B, :H]


# ----------------------------------------------------------------------------
# Parameter init mirroring reset_parameters()
# ----------------------------------------------------------------------------
def init_params(key, input_size, hidden_size):
    # weight_ih: (semi-)orthogonal init (orthonormal rows).
    a = jax.random.normal(key, (3 * hidden_size, input_size), dtype=jnp.float32)
    q, _ = jnp.linalg.qr(a)                        # orthonormal columns
    weight_ih = q.T.astype(jnp.float32)            # (input, 3H)
    # weight_hh: eye(hidden).repeat(1, 3) -> (hidden, 3*hidden)
    weight_hh = jnp.tile(jnp.eye(hidden_size, dtype=jnp.float32), (1, 3))
    bias = jnp.zeros((3 * hidden_size,), dtype=jnp.float32)
    return weight_ih, weight_hh, bias


def reference(input_, h_0, c_0, weight_ih, weight_hh, bias):
    H = c_0.shape[-1]
    gates = bias[None, :] + h_0 @ weight_hh + input_ @ weight_ih
    f, i, g = gates[:, :H], gates[:, H:2 * H], gates[:, 2 * H:]
    return jax.nn.sigmoid(f) * c_0 + jax.nn.sigmoid(i) * jnp.tanh(g)


if __name__ == "__main__":
    input_size, hidden_size, batch = 16, 32, 2

    key = jax.random.PRNGKey(0)
    k_w, k_x, k_h, k_c = jax.random.split(key, 4)

    weight_ih, weight_hh, bias = init_params(k_w, input_size, hidden_size)
    params = pack_params(weight_ih, weight_hh, bias)   # one-time packing

    x = jax.random.normal(k_x, (batch, input_size), dtype=jnp.float32)
    h0 = jax.random.normal(k_h, (batch, hidden_size), dtype=jnp.float32)
    c0 = jax.random.normal(k_c, (batch, hidden_size), dtype=jnp.float32)

    c1 = word_lstm_cell(x, h0, c0, params)
    c1 = jax.block_until_ready(c1)

    c1_ref = reference(x, h0, c0, weight_ih, weight_hh, bias)
    assert c1.shape == (batch, hidden_size)
    assert c1.dtype == c0.dtype
    # bf16 MXU inputs with f32 accumulation + f32 bias -> relaxed tolerance.
    err = float(jnp.max(jnp.abs(c1 - c1_ref)))
    assert jnp.allclose(c1, c1_ref, atol=3e-2, rtol=3e-2), err

    print("KERNEL_OK")
</pallas_src>

<mosaic_0001>
module attributes {stable_mosaic.version = 11 : i64} {
  func.func @_lstm_gates_kernel(%arg0: i32, %arg1: i32, %arg2: memref<16x128xbf16, #tpu.memory_space<vmem>>, %arg3: memref<128x384xbf16, #tpu.memory_space<vmem>>, %arg4: memref<1x384xf32, #tpu.memory_space<vmem>>, %arg5: memref<16x128xf32, #tpu.memory_space<vmem>>, %arg6: memref<16x128xf32, #tpu.memory_space<vmem>>) attributes {dimension_semantics = [#tpu.dimension_semantics<parallel>, #tpu.dimension_semantics<parallel>], iteration_bounds = array<i64: 1, 1>, scalar_prefetch = 0 : i64, scratch_operands = 0 : i64, tpu.core_type = #tpu.core_type<tc>, window_params = [{transform_indices = @transform_0, window_bounds = array<i64: 16, 128>}, {pipeline_mode = #tpu.pipeline_mode<synchronous>, transform_indices = @transform_1, window_bounds = array<i64: 128, 384>}, {transform_indices = @transform_2, window_bounds = array<i64: 1, 384>}, {transform_indices = @transform_3, window_bounds = array<i64: 16, 128>}, {transform_indices = @transform_4, window_bounds = array<i64: 16, 128>}]} {
    %c0 = arith.constant 0 : index
    %c0_0 = arith.constant 0 : index
    %0 = vector.load %arg2[%c0, %c0_0] : memref<16x128xbf16, #tpu.memory_space<vmem>>, vector<16x128xbf16>
    %c0_1 = arith.constant 0 : index
    %c0_2 = arith.constant 0 : index
    %1 = vector.load %arg3[%c0_1, %c0_2] : memref<128x384xbf16, #tpu.memory_space<vmem>>, vector<128x384xbf16>
    %cst = arith.constant dense<0.000000e+00> : vector<16x384xf32>
    %2 = tpu.matmul %0, %1, %cst {dimension_numbers = #tpu.dot_dimension_numbers<[1], [0], [0], [1], [0, 0, 1, 1], [], []>} : vector<16x128xbf16>, vector<128x384xbf16>, vector<16x384xf32> -> vector<16x384xf32>
    %c0_3 = arith.constant 0 : index
    %c0_4 = arith.constant 0 : index
    %3 = vector.load %arg4[%c0_3, %c0_4] : memref<1x384xf32, #tpu.memory_space<vmem>>, vector<1x384xf32>
    %4 = vector.broadcast %3 : vector<1x384xf32> to vector<16x384xf32>
    %5 = arith.addf %2, %4 : vector<16x384xf32>
    %6 = vector.extract_strided_slice %5 {offsets = [0, 0], sizes = [16, 128], strides = [1, 1]} : vector<16x384xf32> to vector<16x128xf32>
    %7 = vector.extract_strided_slice %5 {offsets = [0, 128], sizes = [16, 128], strides = [1, 1]} : vector<16x384xf32> to vector<16x128xf32>
    %8 = vector.extract_strided_slice %5 {offsets = [0, 256], sizes = [16, 128], strides = [1, 1]} : vector<16x384xf32> to vector<16x128xf32>
    %c0_5 = arith.constant 0 : index
    %c0_6 = arith.constant 0 : index
    %9 = vector.load %arg5[%c0_5, %c0_6] : memref<16x128xf32, #tpu.memory_space<vmem>>, vector<16x128xf32>
    %10 = arith.negf %6 : vector<16x128xf32>
    %11 = math.exp %10 : vector<16x128xf32>
    %cst_7 = arith.constant 1.000000e+00 : f32
    %12 = vector.broadcast %cst_7 : f32 to vector<16x128xf32>
    %13 = arith.addf %12, %11 : vector<16x128xf32>
    %14 = arith.divf %12, %13 : vector<16x128xf32>
    %15 = arith.mulf %14, %9 : vector<16x128xf32>
    %16 = arith.negf %7 : vector<16x128xf32>
    %17 = math.exp %16 : vector<16x128xf32>
    %cst_8 = arith.constant 1.000000e+00 : f32
    %18 = vector.broadcast %cst_8 : f32 to vector<16x128xf32>
    %19 = arith.addf %18, %17 : vector<16x128xf32>
    %20 = arith.divf %18, %19 : vector<16x128xf32>
    %21 = math.tanh %8 : vector<16x128xf32>
    %22 = arith.mulf %20, %21 : vector<16x128xf32>
    %23 = arith.addf %15, %22 : vector<16x128xf32>
    %c0_9 = arith.constant 0 : index
    %c0_10 = arith.constant 0 : index
    %24 = vector.load %arg6[%c0_9, %c0_10] : memref<16x128xf32, #tpu.memory_space<vmem>>, vector<16x128xf32>
    tpu.vector_store %arg6[%c0_9, %c0_10], %23 {strides = array<i32>} : memref<16x128xf32, #tpu.memory_space<vmem>>, vector<16x128xf32>,
    return
  }
  func.func @transform_0(%arg0: i32, %arg1: i32) -> (i32, i32) {
    %c0_i32 = arith.constant 0 : i32
    %c0_i32_0 = arith.constant 0 : i32
    return %arg1, %c0_i32 : i32, i32
  }
  func.func @transform_1(%arg0: i32, %arg1: i32) -> (i32, i32) {
    %c0_i32 = arith.constant 0 : i32
    %c0_i32_0 = arith.constant 0 : i32
    return %c0_i32, %arg0 : i32, i32
  }
  func.func @transform_2(%arg0: i32, %arg1: i32) -> (i32, i32) {
    %c0_i32 = arith.constant 0 : i32
    %c0_i32_0 = arith.constant 0 : i32
    return %c0_i32, %arg0 : i32, i32
  }
  func.func @transform_3(%arg0: i32, %arg1: i32) -> (i32, i32) {
    %c0_i32 = arith.constant 0 : i32
    return %arg1, %arg0 : i32, i32
  }
  func.func @transform_4(%arg0: i32, %arg1: i32) -> (i32, i32) {
    %c0_i32 = arith.constant 0 : i32
    return %arg1, %arg0 : i32, i32
  }
}

module attributes {stable_mosaic.version = 11 : i64} {
  func.func @_lstm_gates_kernel(%arg0: i32, %arg1: i32, %arg2: memref<16x128xbf16, #tpu.memory_space<vmem>>, %arg3: memref<128x384xbf16, #tpu.memory_space<vmem>>, %arg4: memref<1x384xf32, #tpu.memory_space<vmem>>, %arg5: memref<16x128xf32, #tpu.memory_space<vmem>>, %arg6: memref<16x128xf32, #tpu.memory_space<vmem>>) attributes {dimension_semantics = [#tpu.dimension_semantics<parallel>, #tpu.dimension_semantics<parallel>], iteration_bounds = array<i64: 1, 1>, scalar_prefetch = 0 : i64, scratch_operands = 0 : i64, tpu.core_type = #tpu.core_type<tc>, window_params = [{transform_indices = @transform_0, window_bounds = array<i64: 16, 128>}, {transform_indices = @transform_1, window_bounds = array<i64: 128, 384>}, {transform_indices = @transform_2, window_bounds = array<i64: 1, 384>}, {transform_indices = @transform_3, window_bounds = array<i64: 16, 128>}, {transform_indices = @transform_4, window_bounds = array<i64: 16, 128>}]} {
    %c0 = arith.constant 0 : index
    %c0_0 = arith.constant 0 : index
    %0 = vector.load %arg2[%c0, %c0_0] : memref<16x128xbf16, #tpu.memory_space<vmem>>, vector<16x128xbf16>
    %c0_1 = arith.constant 0 : index
    %c0_2 = arith.constant 0 : index
    %1 = vector.load %arg3[%c0_1, %c0_2] : memref<128x384xbf16, #tpu.memory_space<vmem>>, vector<128x384xbf16>
    %cst = arith.constant dense<0.000000e+00> : vector<16x384xf32>
    %2 = tpu.matmul %0, %1, %cst {dimension_numbers = #tpu.dot_dimension_numbers<[1], [0], [0], [1], [0, 0, 1, 1], [], []>} : vector<16x128xbf16>, vector<128x384xbf16>, vector<16x384xf32> -> vector<16x384xf32>
    %c0_3 = arith.constant 0 : index
    %c0_4 = arith.constant 0 : index
    %3 = vector.load %arg4[%c0_3, %c0_4] : memref<1x384xf32, #tpu.memory_space<vmem>>, vector<1x384xf32>
    %4 = vector.broadcast %3 : vector<1x384xf32> to vector<16x384xf32>
    %5 = arith.addf %2, %4 : vector<16x384xf32>
    %6 = vector.extract_strided_slice %5 {offsets = [0, 0], sizes = [16, 128], strides = [1, 1]} : vector<16x384xf32> to vector<16x128xf32>
    %7 = vector.extract_strided_slice %5 {offsets = [0, 128], sizes = [16, 128], strides = [1, 1]} : vector<16x384xf32> to vector<16x128xf32>
    %8 = vector.extract_strided_slice %5 {offsets = [0, 256], sizes = [16, 128], strides = [1, 1]} : vector<16x384xf32> to vector<16x128xf32>
    %c0_5 = arith.constant 0 : index
    %c0_6 = arith.constant 0 : index
    %9 = vector.load %arg5[%c0_5, %c0_6] : memref<16x128xf32, #tpu.memory_space<vmem>>, vector<16x128xf32>
    %10 = arith.negf %6 : vector<16x128xf32>
    %11 = math.exp %10 : vector<16x128xf32>
    %cst_7 = arith.constant 1.000000e+00 : f32
    %12 = vector.broadcast %cst_7 : f32 to vector<16x128xf32>
    %13 = arith.addf %12, %11 : vector<16x128xf32>
    %14 = arith.divf %12, %13 : vector<16x128xf32>
    %15 = arith.mulf %14, %9 : vector<16x128xf32>
    %16 = arith.negf %7 : vector<16x128xf32>
    %17 = math.exp %16 : vector<16x128xf32>
    %cst_8 = arith.constant 1.000000e+00 : f32
    %18 = vector.broadcast %cst_8 : f32 to vector<16x128xf32>
    %19 = arith.addf %18, %17 : vector<16x128xf32>
    %20 = arith.divf %18, %19 : vector<16x128xf32>
    %21 = math.tanh %8 : vector<16x128xf32>
    %22 = arith.mulf %20, %21 : vector<16x128xf32>
    %23 = arith.addf %15, %22 : vector<16x128xf32>
    %c0_9 = arith.constant 0 : index
    %c0_10 = arith.constant 0 : index
    %24 = vector.load %arg6[%c0_9, %c0_10] : memref<16x128xf32, #tpu.memory_space<vmem>>, vector<16x128xf32>
    tpu.vector_store %arg6[%c0_9, %c0_10], %23 {strides = array<i32>} : memref<16x128xf32, #tpu.memory_space<vmem>>, vector<16x128xf32>,
    return
  }
  func.func @transform_0(%arg0: i32, %arg1: i32) -> (i32, i32) {
    %c0_i32 = arith.constant 0 : i32
    %c0_i32_0 = arith.constant 0 : i32
    return %arg1, %c0_i32 : i32, i32
  }
  func.func @transform_1(%arg0: i32, %arg1: i32) -> (i32, i32) {
    %c0_i32 = arith.constant 0 : i32
    %c0_i32_0 = arith.constant 0 : i32
    return %c0_i32, %arg0 : i32, i32
  }
  func.func @transform_2(%arg0: i32, %arg1: i32) -> (i32, i32) {
    %c0_i32 = arith.constant 0 : i32
    %c0_i32_0 = arith.constant 0 : i32
    return %c0_i32, %arg0 : i32, i32
  }
  func.func @transform_3(%arg0: i32, %arg1: i32) -> (i32, i32) {
    %c0_i32 = arith.constant 0 : i32
    return %arg1, %arg0 : i32, i32
  }
  func.func @transform_4(%arg0: i32, %arg1: i32) -> (i32, i32) {
    %c0_i32 = arith.constant 0 : i32
    return %arg1, %arg0 : i32, i32
  }
}

</mosaic_0001>

<bundles_post_ra>
// kernel: tpu_custom_call.1
= control target key start
LH: loop header
LB: loop body
LE: loop exit
PB: predicated region body
PF: predicated region fallthrough
CT: control target
= control target key end

     0   :  { %9 = vsyncpa [#allocation3], 0  ;;  %s770_s0 = inlined_call_operand.hbm [shape: bf16[16,128], index: 0, kind: input, shape index: {}]   ;;  %s771_s1 = inlined_call_operand.hbm [shape: bf16[128,384], index: 1, kind: input, shape index: {}]   ;;  %s772_s2 = inlined_call_operand.hbm [shape: f32[1,384], index: 2, kind: input, shape index: {}]   ;;  %s773_s3 = inlined_call_operand.hbm [shape: f32[16,128], index: 3, kind: input, shape index: {}]   ;;  %s774_s4 = inlined_call_operand.hbm [shape: f32[16,128], index: 4, kind: output, shape index: {}]  }
   0x1   :  { %10 = vsyncpa [#allocation6], 0 }
   0x2   :  { %11 = vsyncpa [#allocation9], 0  ;;  %s30_s17 = sshll.u32 %s771_s1, 4  ;;  %s31_s17 = int_to_ptr.hbm [resolvable:$true] %s30_s17 }
   0x3   :  { %12 = vsyncpa [#allocation4], 0  ;;  %s694_s18 = smov [#allocation5]   ;;  %s17_s22 = sshll.u32 %s770_s0, 4  ;;  %s18_s22 = int_to_ptr.hbm [resolvable:$true] %s17_s22 }
   0x4   :  { %s32_s19 = sshll.u32 %s694_s18, 4  ;;  %s695_s23 = smov 192   ;;  %s33_s19 = int_to_ptr.vmem [resolvable:$true] %s32_s19 }
   0x5   :  { %s696_s24 = smov 12   ;;  %s697_s25 = smov [#allocation2]  }
   0x6   :  { %38 = dma.hbm_to_vmem [thread:$0]  %s31_s17, 3072, %s33_s19, [#allocation6], %s695_s23, %s695_s23, %s696_s24  }
   0x7   :  { %s19_s26 = sshll.u32 %s697_s25, 4  ;;  %s698_s27 = smov 64   ;;  %s20_s26 = int_to_ptr.vmem [resolvable:$true] %s19_s26 }
   0x8   :  { %s699_s28 = smov 4   ;;  %s44_s30 = sshll.u32 %s772_s2, 4  ;;  %s45_s30 = int_to_ptr.hbm [resolvable:$true] %s44_s30 }
   0x9   :  { %25 = dma.hbm_to_vmem [thread:$0]  %s18_s22, 128, %s20_s26, [#allocation3], %s698_s27, %s698_s27, %s699_s28  }
   0xa   :  { %s700_s5 = smov [#allocation7]   ;;  %s54_s8 = sshll.u32 %s773_s3, 4  ;;  %s55_s8 = int_to_ptr.hbm [resolvable:$true] %s54_s8 }
   0xb   :  { %s46_s6 = sshll.u32 %s700_s5, 4  ;;  %s701_s9 = smov [#allocation8]   ;;  %s47_s6 = int_to_ptr.vmem [resolvable:$true] %s46_s6 }
   0xc   :  { %49 = dma.hbm_to_vmem [thread:$0]  %s45_s30, 48, %s47_s6, [#allocation6]  }
   0xd   :  { %s56_s10 = sshll.u32 %s701_s9, 4  ;;  %s702_s11 = smov 128   ;;  %s57_s10 = int_to_ptr.vmem [resolvable:$true] %s56_s10 }
   0xe   :  { %s703_s12 = smov 8  }
   0xf   :  { %62 = dma.hbm_to_vmem [thread:$0]  %s55_s8, 256, %s57_s10, [#allocation9], %s702_s11, %s702_s11, %s703_s12  }
  0x10   :  { %686 = dma.done.wait [#allocation3], 128  }
  0x11   :  { %687 = vsyncadd [#allocation3], 4294967168 }
  0x12   :  { %688 = dma.done.wait [#allocation6], 3120  }
  0x13   :  { %689 = vsyncadd [#allocation6], 4294964176 }
  0x14   :  { %690 = dma.done.wait [#allocation9], 256  }
  0x15   :  { %691 = vsyncadd [#allocation9], 4294967040  ;;  %v496_v0 = vld [vmem:[#allocation5 + $0xa8] sm:$0xf]  ;;  %v533_v1 = vld [vmem:[#allocation5 + $0xb0] sm:$0xf0] }
  0x16   :  { %v532_v2 = vld [vmem:[#allocation5 + $0xac] sm:$0xf]  ;;  %v497_v3 = vor.u32 %v533_v1, %v496_v0  ;;  %v498_v4 = vld [vmem:[#allocation5 + $0xb4] sm:$0xf0]  ;;  %v484_v5 = vld [vmem:[#allocation5 + $0x90] sm:$0xf] }
  0x17   :  { %v530_v6 = vld [vmem:[#allocation5 + $0x98] sm:$0xf0]  ;;  %v501_v7 = vor.u32 %v532_v2, %v498_v4  ;;  %v529_v8 = vld [vmem:[#allocation5 + $0x94] sm:$0xf]  ;;  %v486_v9 = vld [vmem:[#allocation5 + $0x9c] sm:$0xf0] }
  0x18   :  { %v504_v10 = vld [vmem:[#allocation5 + $0xb0] sm:$0xf]  ;;  %255 = vmatpush.bf16.msra.mxu0 %v497_v3  ;;  %v485_v11 = vor.u32 %v530_v6, %v484_v5  ;;  %v534_v12 = vld [vmem:[#allocation5 + $0xb8] sm:$0xf0]  ;;  %v489_v13 = vor.u32 %v529_v8, %v486_v9  ;;  %v472_v15 = vld [vmem:[#allocation5 + $0x78] sm:$0xf] }
  0x19   :  { %269 = vmatpush.bf16.msra.mxu1 %v501_v7  ;;  %v505_v14 = vor.u32 %v534_v12, %v504_v10  ;;  %v527_v16 = vld [vmem:[#allocation5 + $0x80] sm:$0xf0]  ;;  %v492_v17 = vld [vmem:[#allocation5 + $0x98] sm:$0xf]  ;;  %v526_v18 = vld [vmem:[#allocation5 + $0x7c] sm:$0xf] }
  0x1a   :  { %v474_v19 = vld [vmem:[#allocation5 + $0x84] sm:$0xf0]  ;;  %v531_v20 = vld [vmem:[#allocation5 + $0xa0] sm:$0xf0]  ;;  %v473_v22 = vor.u32 %v527_v16, %v472_v15  ;;  %v480_v23 = vld [vmem:[#allocation5 + $0x80] sm:$0xf] }
  0x1b   :  { %283 = vmatpush.bf16.msra.mxu2 %v505_v14  ;;  %v493_v21 = vor.u32 %v531_v20, %v492_v17  ;;  %v528_v24 = vld [vmem:[#allocation5 + $0x88] sm:$0xf0]  ;;  %v477_v25 = vor.u32 %v526_v18, %v474_v19  ;;  %v460_v26 = vld [vmem:[#allocation5 + $0x60] sm:$0xf]  ;;  %v523_v28 = vld [vmem:[#allocation5 + $0x64] sm:$0xf] }
  0x1c   :  { %256 = vmatpush.bf16.msra.mxu0 %v485_v11  ;;  %v524_v27 = vld [vmem:[#allocation5 + $0x68] sm:$0xf0]  ;;  %v462_v29 = vld [vmem:[#allocation5 + $0x6c] sm:$0xf0]  ;;  %v481_v30 = vor.u32 %v528_v24, %v480_v23  ;;  %v468_v32 = vld [vmem:[#allocation5 + $0x68] sm:$0xf] }
  0x1d   :  { %270 = vmatpush.bf16.msra.mxu1 %v489_v13  ;;  %v461_v31 = vor.u32 %v524_v27, %v460_v26  ;;  %v525_v33 = vld [vmem:[#allocation5 + $0x70] sm:$0xf0]  ;;  %v465_v34 = vor.u32 %v523_v28, %v462_v29  ;;  %v448_v35 = vld [vmem:[#allocation5 + $0x48] sm:$0xf]  ;;  %v520_v37 = vld [vmem:[#allocation5 + $0x4c] sm:$0xf] }
  0x1e   :  { %v521_v36 = vld [vmem:[#allocation5 + $0x50] sm:$0xf0]  ;;  %v450_v38 = vld [vmem:[#allocation5 + $0x54] sm:$0xf0]  ;;  %v469_v39 = vor.u32 %v525_v33, %v468_v32  ;;  %v456_v41 = vld [vmem:[#allocation5 + $0x50] sm:$0xf] }
  0x1f   :  { %284 = vmatpush.bf16.msra.mxu2 %v493_v21  ;;  %v449_v40 = vor.u32 %v521_v36, %v448_v35  ;;  %v522_v42 = vld [vmem:[#allocation5 + $0x58] sm:$0xf0]  ;;  %v453_v43 = vor.u32 %v520_v37, %v450_v38  ;;  %v436_v44 = vld [vmem:[#allocation5 + $0x30] sm:$0xf]  ;;  %v517_v46 = vld [vmem:[#allocation5 + $0x34] sm:$0xf] }
  0x20   :  { %257 = vmatpush.bf16.msra.mxu0 %v473_v22  ;;  %v518_v45 = vld [vmem:[#allocation5 + $0x38] sm:$0xf0]  ;;  %v438_v47 = vld [vmem:[#allocation5 + $0x3c] sm:$0xf0]  ;;  %v457_v48 = vor.u32 %v522_v42, %v456_v41  ;;  %v444_v50 = vld [vmem:[#allocation5 + $0x38] sm:$0xf] }
  0x21   :  { %271 = vmatpush.bf16.msra.mxu1 %v477_v25  ;;  %v437_v49 = vor.u32 %v518_v45, %v436_v44  ;;  %v519_v51 = vld [vmem:[#allocation5 + $0x40] sm:$0xf0]  ;;  %v441_v52 = vor.u32 %v517_v46, %v438_v47  ;;  %v424_v53 = vld [vmem:[#allocation5 + $0x18] sm:$0xf]  ;;  %v514_v55 = vld [vmem:[#allocation5 + $0x1c] sm:$0xf] }
  0x22   :  { %v515_v54 = vld [vmem:[#allocation5 + $0x20] sm:$0xf0]  ;;  %v426_v56 = vld [vmem:[#allocation5 + $0x24] sm:$0xf0]  ;;  %v445_v57 = vor.u32 %v519_v51, %v444_v50  ;;  %v432_v59 = vld [vmem:[#allocation5 + $0x20] sm:$0xf] }
  0x23   :  { %285 = vmatpush.bf16.msra.mxu2 %v481_v30  ;;  %v425_v58 = vor.u32 %v515_v54, %v424_v53  ;;  %v516_v60 = vld [vmem:[#allocation5 + $0x28] sm:$0xf0]  ;;  %v429_v61 = vor.u32 %v514_v55, %v426_v56  ;;  %v412_v62 = vld [vmem:[#allocation5] sm:$0xf]  ;;  %v511_v0 = vld [vmem:[#allocation5 + $0x4] sm:$0xf] }
  0x24   :  { %258 = vmatpush.bf16.msra.mxu0 %v461_v31  ;;  %v512_v63 = vld [vmem:[#allocation5 + $0x8] sm:$0xf0]  ;;  %v414_v1 = vld [vmem:[#allocation5 + $0xc] sm:$0xf0]  ;;  %v433_v2 = vor.u32 %v516_v60, %v432_v59  ;;  %v420_v4 = vld [vmem:[#allocation5 + $0x8] sm:$0xf] }
  0x25   :  { %272 = vmatpush.bf16.msra.mxu1 %v465_v34  ;;  %v413_v3 = vor.u32 %v512_v63, %v412_v62  ;;  %v513_v5 = vld [vmem:[#allocation5 + $0x10] sm:$0xf0]  ;;  %v417_v6 = vor.u32 %v511_v0, %v414_v1  ;;  %v510_v7 = vld [vmem:[#allocation2] sm:$0xff]  ;;  %v745_v9 = vld [vmem:[#allocation7] sm:$0x7]  ;;  %s704_s2 = smov [#allocation10]  }
  0x26   :  { %v421_v8 = vor.u32 %v513_v5, %v420_v4  ;;  %v115_v10 = vperm.slane %v745_v9, 0  ;;  %v116_v11 = vperm.slane %v745_v9, 1  ;;  %v117_v28 = vperm.slane %v745_v9, 2  ;;  %v297_v51 = vld [vmem:[#allocation8] sm:$0xff]  ;;  %s389_s3 = sshll.u32 %s704_s2, 4  ;;  %s391_s15 = sshll.u32 %s774_s4, 4  ;;  %s390_s3 = int_to_ptr.vmem [resolvable:$true] %s389_s3  ;;  %s392_s15 = int_to_ptr.hbm [resolvable:$true] %s391_s15 }
  0x27   :  { %286 = vmatpush.bf16.msra.mxu2 %v469_v39 }
  0x28   :  { %259 = vmatpush.bf16.msra.mxu0 %v449_v40 }
  0x29   :  { %273 = vmatpush.bf16.msra.mxu1 %v453_v43 }
  0x2b   :  { %287 = vmatpush.bf16.msra.mxu2 %v457_v48 }
  0x2c   :  { %260 = vmatpush.bf16.msra.mxu0 %v437_v49 }
  0x2d   :  { %274 = vmatpush.bf16.msra.mxu1 %v441_v52 }
  0x2f   :  { %288 = vmatpush.bf16.msra.mxu2 %v445_v57 }
  0x30   :  { %261 = vmatpush.bf16.msra.mxu0 %v425_v58 }
  0x31   :  { %275 = vmatpush.bf16.msra.mxu1 %v429_v61 }
  0x33   :  { %289 = vmatpush.bf16.msra.mxu2 %v433_v2 }
  0x34   :  { %262 = vmatpush.bf16.msra.mxu0 %v413_v3 }
  0x35   :  { %276 = vmatpush.bf16.msra.mxu1 %v417_v6 }
  0x37   :  { %263 = vmatmul.bf16.vlgmr.msra.gmra.mxu0 %v510_v7  ;;  %290 = vmatpush.bf16.msra.mxu2 %v421_v8 }
  0x38   :  { %277 = vmatmul.bf16.vlgmr.msra.gmra.mxu1 %v510_v7 }
  0x3a   :  { %291 = vmatmul.bf16.vlgmr.msra.gmra.mxu2 %v510_v7 }
  0xb4   :  { %v264_v12 = vpop.f32.mrf.mxu0 }
  0xb5   :  { %v265_v13 = vadd.f32 %v264_v12, %v115_v10  ;;  %v278_v14 = vpop.f32.mrf.mxu1  ;;  %v298_v12 = vld [vmem:[#allocation8 + $0x8] sm:$0xff] }
  0xb6   :  { %v279_v15 = vadd.f32 %v278_v14, %v116_v11 }
  0xb7   :  { %v506_v16 = vmul.f32 -1.442695, %v265_v13 }
  0xb8   :  { %v508_v17 = vmul.f32 -1.442695, %v279_v15 }
  0xb9   :  { %546 = vpow2.f32 %v506_v16 }
  0xba   :  { %548 = vpow2.f32 %v508_v17 }
  0xbc   :  { %v266_v18 = vpop.f32.mrf.mxu0 }
  0xbd   :  { %v267_v19 = vadd.f32 %v266_v18, %v115_v10  ;;  %v280_v20 = vpop.f32.mrf.mxu1  ;;  %v292_v29 = vpop.f32.mrf.mxu2 }
  0xbe   :  { %v281_v21 = vadd.f32 %v280_v20, %v116_v11  ;;  %v293_v31 = vadd.f32 %v292_v29, %v117_v28 }
  0xbf   :  { %v547_v22 = vpop.eup %546  ;;  %v507_v23 = vmul.f32 -1.442695, %v267_v19 }
  0xc0   :  { %v549_v24 = vpop.eup %548  ;;  %v305_v25 = vadd.f32 1.0, %v547_v22  ;;  %v509_v26 = vmul.f32 -1.442695, %v281_v21 }
  0xc1   :  { %v345_v27 = vadd.f32 1.0, %v549_v24  ;;  %550 = vpow2.f32 %v507_v23 }
  0xc2   :  { %552 = vrcp.f32 %v305_v25  ;;  %v316_v41 = vand.u32 2147483647, %v305_v25  ;;  %v318_v42 = vand.u32 2147483648, %v305_v25  ;;  %vm312_vm2 = vweird.f32 %v305_v25 }
  0xc3   :  { %554 = vrcp.f32 %v345_v27  ;;  %v358_v44 = vand.u32 2147483648, %v345_v27  ;;  %v356_v46 = vand.u32 2147483647, %v345_v27  ;;  %vm352_vm3 = vweird.f32 %v345_v27 }
  0xc4   :  { %556 = vpow2.f32 %v509_v26  ;;  %v319_v52 = vor.u32 1.1754944e-38, %v318_v42  ;;  %vm317_vm6 = vcmp.eq.f32.partialorder %v316_v41, 8.507059e+37 }
  0xc5   :  { %v294_v50 = vpop.f32.mrf.mxu2  ;;  %v359_v55 = vor.u32 1.1754944e-38, %v358_v44  ;;  %vm357_vm7 = vcmp.eq.f32.partialorder %v356_v46, 8.507059e+37 }
  0xc6   :  { %v295_v62 = vadd.f32 %v294_v50, %v117_v28 }
  0xc7   :  { %v551_v30 = vpop.eup %550 }
  0xc8   :  { %v553_v32 = vpop.eup %552  ;;  %v750_v33 = vadd.f32 1.0, %v551_v30 }
  0xc9   :  { %v555_v34 = vpop.eup %554  ;;  %v308_v35 = vmul.f32 %v553_v32, %v305_v25  ;;  %vm313_vm0 = vweird.f32 %v553_v32 }
  0xca   :  { %v557_v36 = vpop.eup %556  ;;  %v348_v37 = vmul.f32 %v555_v34, %v345_v27  ;;  %558 = vrcp.f32 %v750_v33  ;;  %vm353_vm1 = vweird.f32 %v555_v34  ;;  %vm314_vm4 = vmor %vm312_vm2, %vm313_vm0  ;;  %v333_v2 = vand.u32 2147483648, %v750_v33 }
  0xcb   :  { %v309_v38 = vsub.f32 1.0, %v308_v35  ;;  %v753_v39 = vadd.f32 1.0, %v557_v36  ;;  %560 = vtanh.f32 %v293_v31  ;;  %vm354_vm5 = vmor %vm352_vm3, %vm353_vm1  ;;  %v331_v4 = vand.u32 2147483647, %v750_v33 }
  0xcc   :  { %v349_v40 = vsub.f32 1.0, %v348_v37  ;;  %vm327_vm9 = vweird.f32 %v750_v33  ;;  %v334_v11 = vor.u32 1.1754944e-38, %v333_v2 }
  0xcd   :  { %v310_v43 = vmul.f32 %v553_v32, %v309_v38  ;;  %562 = vrcp.f32 %v753_v39  ;;  %v373_v7 = vand.u32 2147483648, %v753_v39  ;;  %v371_v10 = vand.u32 2147483647, %v753_v39 }
  0xce   :  { %v350_v45 = vmul.f32 %v555_v34, %v349_v40  ;;  %564 = vtanh.f32 %v295_v62  ;;  %vm332_vm12 = vcmp.eq.f32.partialorder %v331_v4, 8.507059e+37  ;;  %vm367_vm13 = vweird.f32 %v753_v39 }
  0xcf   :  { %v311_v47 = vadd.f32 %v553_v32, %v310_v43  ;;  %v374_v16 = vor.u32 1.1754944e-38, %v373_v7  ;;  %vm372_vm15 = vcmp.eq.f32.partialorder %v371_v10, 8.507059e+37 }
  0xd0   :  { %v559_v48 = vpop.eup %558  ;;  %v351_v49 = vadd.f32 %v555_v34, %v350_v45 }
  0xd1   :  { %v561_v53 = vpop.eup %560  ;;  %v323_v54 = vmul.f32 %v559_v48, %v750_v33  ;;  %v315_v56 = vsel %vm314_vm4, %v553_v32, %v311_v47  ;;  %vm328_vm8 = vweird.f32 %v559_v48 }
  0xd2   :  { %v355_v57 = vsel %vm354_vm5, %v555_v34, %v351_v49  ;;  %v320_v58 = vsel %vm317_vm6, %v319_v52, %v315_v56  ;;  %vm329_vm11 = vmor %vm327_vm9, %vm328_vm8 }
  0xd3   :  { %v563_v59 = vpop.eup %562  ;;  %v324_v60 = vsub.f32 1.0, %v323_v54  ;;  %v360_v61 = vsel %vm357_vm7, %v359_v55, %v355_v57  ;;  %v337_v63 = vmul.f32 %v320_v58, %v297_v51 }
  0xd4   :  { %v363_v0 = vmul.f32 %v563_v59, %v753_v39  ;;  %v379_v1 = vmul.f32 %v561_v53, %v360_v61  ;;  %vm368_vm10 = vweird.f32 %v563_v59  ;;  %v565_v19 = vpop.eup %564 }
  0xd5   :  { %v325_v3 = vmul.f32 %v559_v48, %v324_v60  ;;  %vm369_vm14 = vmor %vm367_vm13, %vm368_vm10 }
  0xd6   :  { %v364_v5 = vsub.f32 1.0, %v363_v0  ;;  %v381_v6 = vadd.f32 %v379_v1, %v337_v63 }
  0xd7   :  { %v326_v8 = vadd.f32 %v559_v48, %v325_v3 }
  0xd8   :  { %v365_v9 = vmul.f32 %v563_v59, %v364_v5  ;;  %383 = vst [vmem:[#allocation10] sm:$0xff] %v381_v6 }
  0xd9   :  { %v330_v13 = vsel %vm329_vm11, %v559_v48, %v326_v8 }
  0xda   :  { %v366_v14 = vadd.f32 %v563_v59, %v365_v9  ;;  %v335_v15 = vsel %vm332_vm12, %v334_v11, %v330_v13 }
  0xdb   :  { %v338_v18 = vmul.f32 %v335_v15, %v298_v12 }
  0xdc   :  { %v370_v17 = vsel %vm369_vm14, %v563_v59, %v366_v14 }
  0xdd   :  { %v375_v20 = vsel %vm372_vm15, %v374_v16, %v370_v17 }
  0xde   :  { %v380_v21 = vmul.f32 %v565_v19, %v375_v20 }
  0xe0   :  { %v382_v22 = vadd.f32 %v380_v21, %v338_v18 }
  0xe2   :  { %384 = vst [vmem:[#allocation10 + $0x8] sm:$0xff] %v382_v22 }
  0xe3   :  { %397 = dma.vmem_to_hbm [thread:$0]  %s390_s3, 256, %s392_s15, [#allocation4], %s702_s11, %s702_s11, %s703_s12  }
  0xe4   :  { %692 = dma.done.wait [#allocation4], 256  }
  0xe5   :  { %693 = vsyncadd [#allocation4], 4294967040 }
  0xe6   :  { %402 = vsyncpa [#allocation3], 1 }
  0xe7   :  { %403 = vsyncpa [#allocation6], 1 }
  0xe8   :  { %404 = vsyncpa [#allocation9], 1 }
  0xe9   :  { %405 = vsyncpa [#allocation4], 1 }

// kernel: tpu_custom_call.1
= control target key start
LH: loop header
LB: loop body
LE: loop exit
PB: predicated region body
PF: predicated region fallthrough
CT: control target
= control target key end

     0   :  { %9 = vsyncpa [#allocation3], 0  ;;  %s770_s0 = inlined_call_operand.hbm [shape: bf16[16,128], index: 0, kind: input, shape index: {}]   ;;  %s771_s1 = inlined_call_operand.hbm [shape: bf16[128,384], index: 1, kind: input, shape index: {}]   ;;  %s772_s2 = inlined_call_operand.hbm [shape: f32[1,384], index: 2, kind: input, shape index: {}]   ;;  %s773_s3 = inlined_call_operand.hbm [shape: f32[16,128], index: 3, kind: input, shape index: {}]   ;;  %s774_s4 = inlined_call_operand.hbm [shape: f32[16,128], index: 4, kind: output, shape index: {}]  }
   0x1   :  { %10 = vsyncpa [#allocation6], 0 }
   0x2   :  { %11 = vsyncpa [#allocation9], 0  ;;  %s30_s17 = sshll.u32 %s771_s1, 4  ;;  %s31_s17 = int_to_ptr.hbm [resolvable:$true] %s30_s17 }
   0x3   :  { %12 = vsyncpa [#allocation4], 0  ;;  %s694_s18 = smov [#allocation5]   ;;  %s17_s22 = sshll.u32 %s770_s0, 4  ;;  %s18_s22 = int_to_ptr.hbm [resolvable:$true] %s17_s22 }
   0x4   :  { %s32_s19 = sshll.u32 %s694_s18, 4  ;;  %s695_s23 = smov 192   ;;  %s33_s19 = int_to_ptr.vmem [resolvable:$true] %s32_s19 }
   0x5   :  { %s696_s24 = smov 12   ;;  %s697_s25 = smov [#allocation2]  }
   0x6   :  { %38 = dma.hbm_to_vmem [thread:$0]  %s31_s17, 3072, %s33_s19, [#allocation6], %s695_s23, %s695_s23, %s696_s24  }
   0x7   :  { %s19_s26 = sshll.u32 %s697_s25, 4  ;;  %s698_s27 = smov 64   ;;  %s20_s26 = int_to_ptr.vmem [resolvable:$true] %s19_s26 }
   0x8   :  { %s699_s28 = smov 4   ;;  %s44_s30 = sshll.u32 %s772_s2, 4  ;;  %s45_s30 = int_to_ptr.hbm [resolvable:$true] %s44_s30 }
   0x9   :  { %25 = dma.hbm_to_vmem [thread:$0]  %s18_s22, 128, %s20_s26, [#allocation3], %s698_s27, %s698_s27, %s699_s28  }
   0xa   :  { %s700_s5 = smov [#allocation7]   ;;  %s54_s8 = sshll.u32 %s773_s3, 4  ;;  %s55_s8 = int_to_ptr.hbm [resolvable:$true] %s54_s8 }
   0xb   :  { %s46_s6 = sshll.u32 %s700_s5, 4  ;;  %s701_s9 = smov [#allocation8]   ;;  %s47_s6 = int_to_ptr.vmem [resolvable:$true] %s46_s6 }
   0xc   :  { %49 = dma.hbm_to_vmem [thread:$0]  %s45_s30, 48, %s47_s6, [#allocation6]  }
   0xd   :  { %s56_s10 = sshll.u32 %s701_s9, 4  ;;  %s702_s11 = smov 128   ;;  %s57_s10 = int_to_ptr.vmem [resolvable:$true] %s56_s10 }
   0xe   :  { %s703_s12 = smov 8  }
   0xf   :  { %62 = dma.hbm_to_vmem [thread:$0]  %s55_s8, 256, %s57_s10, [#allocation9], %s702_s11, %s702_s11, %s703_s12  }
  0x10   :  { %686 = dma.done.wait [#allocation3], 128  }
  0x11   :  { %687 = vsyncadd [#allocation3], 4294967168 }
  0x12   :  { %688 = dma.done.wait [#allocation6], 3120  }
  0x13   :  { %689 = vsyncadd [#allocation6], 4294964176 }
  0x14   :  { %690 = dma.done.wait [#allocation9], 256  }
  0x15   :  { %691 = vsyncadd [#allocation9], 4294967040  ;;  %v496_v0 = vld [vmem:[#allocation5 + $0xa8] sm:$0xf]  ;;  %v533_v1 = vld [vmem:[#allocation5 + $0xb0] sm:$0xf0] }
  0x16   :  { %v532_v2 = vld [vmem:[#allocation5 + $0xac] sm:$0xf]  ;;  %v497_v3 = vor.u32 %v533_v1, %v496_v0  ;;  %v498_v4 = vld [vmem:[#allocation5 + $0xb4] sm:$0xf0]  ;;  %v484_v5 = vld [vmem:[#allocation5 + $0x90] sm:$0xf] }
  0x17   :  { %v530_v6 = vld [vmem:[#allocation5 + $0x98] sm:$0xf0]  ;;  %v501_v7 = vor.u32 %v532_v2, %v498_v4  ;;  %v529_v8 = vld [vmem:[#allocation5 + $0x94] sm:$0xf]  ;;  %v486_v9 = vld [vmem:[#allocation5 + $0x9c] sm:$0xf0] }
  0x18   :  { %v504_v10 = vld [vmem:[#allocation5 + $0xb0] sm:$0xf]  ;;  %255 = vmatpush.bf16.msra.mxu0 %v497_v3  ;;  %v485_v11 = vor.u32 %v530_v6, %v484_v5  ;;  %v534_v12 = vld [vmem:[#allocation5 + $0xb8] sm:$0xf0]  ;;  %v489_v13 = vor.u32 %v529_v8, %v486_v9  ;;  %v472_v15 = vld [vmem:[#allocation5 + $0x78] sm:$0xf] }
  0x19   :  { %269 = vmatpush.bf16.msra.mxu1 %v501_v7  ;;  %v505_v14 = vor.u32 %v534_v12, %v504_v10  ;;  %v527_v16 = vld [vmem:[#allocation5 + $0x80] sm:$0xf0]  ;;  %v492_v17 = vld [vmem:[#allocation5 + $0x98] sm:$0xf]  ;;  %v526_v18 = vld [vmem:[#allocation5 + $0x7c] sm:$0xf] }
  0x1a   :  { %v474_v19 = vld [vmem:[#allocation5 + $0x84] sm:$0xf0]  ;;  %v531_v20 = vld [vmem:[#allocation5 + $0xa0] sm:$0xf0]  ;;  %v473_v22 = vor.u32 %v527_v16, %v472_v15  ;;  %v480_v23 = vld [vmem:[#allocation5 + $0x80] sm:$0xf] }
  0x1b   :  { %283 = vmatpush.bf16.msra.mxu2 %v505_v14  ;;  %v493_v21 = vor.u32 %v531_v20, %v492_v17  ;;  %v528_v24 = vld [vmem:[#allocation5 + $0x88] sm:$0xf0]  ;;  %v477_v25 = vor.u32 %v526_v18, %v474_v19  ;;  %v460_v26 = vld [vmem:[#allocation5 + $0x60] sm:$0xf]  ;;  %v523_v28 = vld [vmem:[#allocation5 + $0x64] sm:$0xf] }
  0x1c   :  { %256 = vmatpush.bf16.msra.mxu0 %v485_v11  ;;  %v524_v27 = vld [vmem:[#allocation5 + $0x68] sm:$0xf0]  ;;  %v462_v29 = vld [vmem:[#allocation5 + $0x6c] sm:$0xf0]  ;;  %v481_v30 = vor.u32 %v528_v24, %v480_v23  ;;  %v468_v32 = vld [vmem:[#allocation5 + $0x68] sm:$0xf] }
  0x1d   :  { %270 = vmatpush.bf16.msra.mxu1 %v489_v13  ;;  %v461_v31 = vor.u32 %v524_v27, %v460_v26  ;;  %v525_v33 = vld [vmem:[#allocation5 + $0x70] sm:$0xf0]  ;;  %v465_v34 = vor.u32 %v523_v28, %v462_v29  ;;  %v448_v35 = vld [vmem:[#allocation5 + $0x48] sm:$0xf]  ;;  %v520_v37 = vld [vmem:[#allocation5 + $0x4c] sm:$0xf] }
  0x1e   :  { %v521_v36 = vld [vmem:[#allocation5 + $0x50] sm:$0xf0]  ;;  %v450_v38 = vld [vmem:[#allocation5 + $0x54] sm:$0xf0]  ;;  %v469_v39 = vor.u32 %v525_v33, %v468_v32  ;;  %v456_v41 = vld [vmem:[#allocation5 + $0x50] sm:$0xf] }
  0x1f   :  { %284 = vmatpush.bf16.msra.mxu2 %v493_v21  ;;  %v449_v40 = vor.u32 %v521_v36, %v448_v35  ;;  %v522_v42 = vld [vmem:[#allocation5 + $0x58] sm:$0xf0]  ;;  %v453_v43 = vor.u32 %v520_v37, %v450_v38  ;;  %v436_v44 = vld [vmem:[#allocation5 + $0x30] sm:$0xf]  ;;  %v517_v46 = vld [vmem:[#allocation5 + $0x34] sm:$0xf] }
  0x20   :  { %257 = vmatpush.bf16.msra.mxu0 %v473_v22  ;;  %v518_v45 = vld [vmem:[#allocation5 + $0x38] sm:$0xf0]  ;;  %v438_v47 = vld [vmem:[#allocation5 + $0x3c] sm:$0xf0]  ;;  %v457_v48 = vor.u32 %v522_v42, %v456_v41  ;;  %v444_v50 = vld [vmem:[#allocation5 + $0x38] sm:$0xf] }
  0x21   :  { %271 = vmatpush.bf16.msra.mxu1 %v477_v25  ;;  %v437_v49 = vor.u32 %v518_v45, %v436_v44  ;;  %v519_v51 = vld [vmem:[#allocation5 + $0x40] sm:$0xf0]  ;;  %v441_v52 = vor.u32 %v517_v46, %v438_v47  ;;  %v424_v53 = vld [vmem:[#allocation5 + $0x18] sm:$0xf]  ;;  %v514_v55 = vld [vmem:[#allocation5 + $0x1c] sm:$0xf] }
  0x22   :  { %v515_v54 = vld [vmem:[#allocation5 + $0x20] sm:$0xf0]  ;;  %v426_v56 = vld [vmem:[#allocation5 + $0x24] sm:$0xf0]  ;;  %v445_v57 = vor.u32 %v519_v51, %v444_v50  ;;  %v432_v59 = vld [vmem:[#allocation5 + $0x20] sm:$0xf] }
  0x23   :  { %285 = vmatpush.bf16.msra.mxu2 %v481_v30  ;;  %v425_v58 = vor.u32 %v515_v54, %v424_v53  ;;  %v516_v60 = vld [vmem:[#allocation5 + $0x28] sm:$0xf0]  ;;  %v429_v61 = vor.u32 %v514_v55, %v426_v56  ;;  %v412_v62 = vld [vmem:[#allocation5] sm:$0xf]  ;;  %v511_v0 = vld [vmem:[#allocation5 + $0x4] sm:$0xf] }
  0x24   :  { %258 = vmatpush.bf16.msra.mxu0 %v461_v31  ;;  %v512_v63 = vld [vmem:[#allocation5 + $0x8] sm:$0xf0]  ;;  %v414_v1 = vld [vmem:[#allocation5 + $0xc] sm:$0xf0]  ;;  %v433_v2 = vor.u32 %v516_v60, %v432_v59  ;;  %v420_v4 = vld [vmem:[#allocation5 + $0x8] sm:$0xf] }
  0x25   :  { %272 = vmatpush.bf16.msra.mxu1 %v465_v34  ;;  %v413_v3 = vor.u32 %v512_v63, %v412_v62  ;;  %v513_v5 = vld [vmem:[#allocation5 + $0x10] sm:$0xf0]  ;;  %v417_v6 = vor.u32 %v511_v0, %v414_v1  ;;  %v510_v7 = vld [vmem:[#allocation2] sm:$0xff]  ;;  %v745_v9 = vld [vmem:[#allocation7] sm:$0x7]  ;;  %s704_s2 = smov [#allocation10]  }
  0x26   :  { %v421_v8 = vor.u32 %v513_v5, %v420_v4  ;;  %v115_v10 = vperm.slane %v745_v9, 0  ;;  %v116_v11 = vperm.slane %v745_v9, 1  ;;  %v117_v28 = vperm.slane %v745_v9, 2  ;;  %v297_v51 = vld [vmem:[#allocation8] sm:$0xff]  ;;  %s389_s3 = sshll.u32 %s704_s2, 4  ;;  %s391_s15 = sshll.u32 %s774_s4, 4  ;;  %s390_s3 = int_to_ptr.vmem [resolvable:$true] %s389_s3  ;;  %s392_s15 = int_to_ptr.hbm [resolvable:$true] %s391_s15 }
  0x27   :  { %286 = vmatpush.bf16.msra.mxu2 %v469_v39 }
  0x28   :  { %259 = vmatpush.bf16.msra.mxu0 %v449_v40 }
  0x29   :  { %273 = vmatpush.bf16.msra.mxu1 %v453_v43 }
  0x2b   :  { %287 = vmatpush.bf16.msra.mxu2 %v457_v48 }
  0x2c   :  { %260 = vmatpush.bf16.msra.mxu0 %v437_v49 }
  0x2d   :  { %274 = vmatpush.bf16.msra.mxu1 %v441_v52 }
  0x2f   :  { %288 = vmatpush.bf16.msra.mxu2 %v445_v57 }
  0x30   :  { %261 = vmatpush.bf16.msra.mxu0 %v425_v58 }
  0x31   :  { %275 = vmatpush.bf16.msra.mxu1 %v429_v61 }
  0x33   :  { %289 = vmatpush.bf16.msra.mxu2 %v433_v2 }
  0x34   :  { %262 = vmatpush.bf16.msra.mxu0 %v413_v3 }
  0x35   :  { %276 = vmatpush.bf16.msra.mxu1 %v417_v6 }
  0x37   :  { %263 = vmatmul.bf16.vlgmr.msra.gmra.mxu0 %v510_v7  ;;  %290 = vmatpush.bf16.msra.mxu2 %v421_v8 }
  0x38   :  { %277 = vmatmul.bf16.vlgmr.msra.gmra.mxu1 %v510_v7 }
  0x3a   :  { %291 = vmatmul.bf16.vlgmr.msra.gmra.mxu2 %v510_v7 }
  0xb4   :  { %v264_v12 = vpop.f32.mrf.mxu0 }
  0xb5   :  { %v265_v13 = vadd.f32 %v264_v12, %v115_v10  ;;  %v278_v14 = vpop.f32.mrf.mxu1  ;;  %v298_v12 = vld [vmem:[#allocation8 + $0x8] sm:$0xff] }
  0xb6   :  { %v279_v15 = vadd.f32 %v278_v14, %v116_v11 }
  0xb7   :  { %v506_v16 = vmul.f32 -1.442695, %v265_v13 }
  0xb8   :  { %v508_v17 = vmul.f32 -1.442695, %v279_v15 }
  0xb9   :  { %546 = vpow2.f32 %v506_v16 }
  0xba   :  { %548 = vpow2.f32 %v508_v17 }
  0xbc   :  { %v266_v18 = vpop.f32.mrf.mxu0 }
  0xbd   :  { %v267_v19 = vadd.f32 %v266_v18, %v115_v10  ;;  %v280_v20 = vpop.f32.mrf.mxu1  ;;  %v292_v29 = vpop.f32.mrf.mxu2 }
  0xbe   :  { %v281_v21 = vadd.f32 %v280_v20, %v116_v11  ;;  %v293_v31 = vadd.f32 %v292_v29, %v117_v28 }
  0xbf   :  { %v547_v22 = vpop.eup %546  ;;  %v507_v23 = vmul.f32 -1.442695, %v267_v19 }
  0xc0   :  { %v549_v24 = vpop.eup %548  ;;  %v305_v25 = vadd.f32 1.0, %v547_v22  ;;  %v509_v26 = vmul.f32 -1.442695, %v281_v21 }
  0xc1   :  { %v345_v27 = vadd.f32 1.0, %v549_v24  ;;  %550 = vpow2.f32 %v507_v23 }
  0xc2   :  { %552 = vrcp.f32 %v305_v25  ;;  %v316_v41 = vand.u32 2147483647, %v305_v25  ;;  %v318_v42 = vand.u32 2147483648, %v305_v25  ;;  %vm312_vm2 = vweird.f32 %v305_v25 }
  0xc3   :  { %554 = vrcp.f32 %v345_v27  ;;  %v358_v44 = vand.u32 2147483648, %v345_v27  ;;  %v356_v46 = vand.u32 2147483647, %v345_v27  ;;  %vm352_vm3 = vweird.f32 %v345_v27 }
  0xc4   :  { %556 = vpow2.f32 %v509_v26  ;;  %v319_v52 = vor.u32 1.1754944e-38, %v318_v42  ;;  %vm317_vm6 = vcmp.eq.f32.partialorder %v316_v41, 8.507059e+37 }
  0xc5   :  { %v294_v50 = vpop.f32.mrf.mxu2  ;;  %v359_v55 = vor.u32 1.1754944e-38, %v358_v44  ;;  %vm357_vm7 = vcmp.eq.f32.partialorder %v356_v46, 8.507059e+37 }
  0xc6   :  { %v295_v62 = vadd.f32 %v294_v50, %v117_v28 }
  0xc7   :  { %v551_v30 = vpop.eup %550 }
  0xc8   :  { %v553_v32 = vpop.eup %552  ;;  %v750_v33 = vadd.f32 1.0, %v551_v30 }
  0xc9   :  { %v555_v34 = vpop.eup %554  ;;  %v308_v35 = vmul.f32 %v553_v32, %v305_v25  ;;  %vm313_vm0 = vweird.f32 %v553_v32 }
  0xca   :  { %v557_v36 = vpop.eup %556  ;;  %v348_v37 = vmul.f32 %v555_v34, %v345_v27  ;;  %558 = vrcp.f32 %v750_v33  ;;  %vm353_vm1 = vweird.f32 %v555_v34  ;;  %vm314_vm4 = vmor %vm312_vm2, %vm313_vm0  ;;  %v333_v2 = vand.u32 2147483648, %v750_v33 }
  0xcb   :  { %v309_v38 = vsub.f32 1.0, %v308_v35  ;;  %v753_v39 = vadd.f32 1.0, %v557_v36  ;;  %560 = vtanh.f32 %v293_v31  ;;  %vm354_vm5 = vmor %vm352_vm3, %vm353_vm1  ;;  %v331_v4 = vand.u32 2147483647, %v750_v33 }
  0xcc   :  { %v349_v40 = vsub.f32 1.0, %v348_v37  ;;  %vm327_vm9 = vweird.f32 %v750_v33  ;;  %v334_v11 = vor.u32 1.1754944e-38, %v333_v2 }
  0xcd   :  { %v310_v43 = vmul.f32 %v553_v32, %v309_v38  ;;  %562 = vrcp.f32 %v753_v39  ;;  %v373_v7 = vand.u32 2147483648, %v753_v39  ;;  %v371_v10 = vand.u32 2147483647, %v753_v39 }
  0xce   :  { %v350_v45 = vmul.f32 %v555_v34, %v349_v40  ;;  %564 = vtanh.f32 %v295_v62  ;;  %vm332_vm12 = vcmp.eq.f32.partialorder %v331_v4, 8.507059e+37  ;;  %vm367_vm13 = vweird.f32 %v753_v39 }
  0xcf   :  { %v311_v47 = vadd.f32 %v553_v32, %v310_v43  ;;  %v374_v16 = vor.u32 1.1754944e-38, %v373_v7  ;;  %vm372_vm15 = vcmp.eq.f32.partialorder %v371_v10, 8.507059e+37 }
  0xd0   :  { %v559_v48 = vpop.eup %558  ;;  %v351_v49 = vadd.f32 %v555_v34, %v350_v45 }
  0xd1   :  { %v561_v53 = vpop.eup %560  ;;  %v323_v54 = vmul.f32 %v559_v48, %v750_v33  ;;  %v315_v56 = vsel %vm314_vm4, %v553_v32, %v311_v47  ;;  %vm328_vm8 = vweird.f32 %v559_v48 }
  0xd2   :  { %v355_v57 = vsel %vm354_vm5, %v555_v34, %v351_v49  ;;  %v320_v58 = vsel %vm317_vm6, %v319_v52, %v315_v56  ;;  %vm329_vm11 = vmor %vm327_vm9, %vm328_vm8 }
  0xd3   :  { %v563_v59 = vpop.eup %562  ;;  %v324_v60 = vsub.f32 1.0, %v323_v54  ;;  %v360_v61 = vsel %vm357_vm7, %v359_v55, %v355_v57  ;;  %v337_v63 = vmul.f32 %v320_v58, %v297_v51 }
  0xd4   :  { %v363_v0 = vmul.f32 %v563_v59, %v753_v39  ;;  %v379_v1 = vmul.f32 %v561_v53, %v360_v61  ;;  %vm368_vm10 = vweird.f32 %v563_v59  ;;  %v565_v19 = vpop.eup %564 }
  0xd5   :  { %v325_v3 = vmul.f32 %v559_v48, %v324_v60  ;;  %vm369_vm14 = vmor %vm367_vm13, %vm368_vm10 }
  0xd6   :  { %v364_v5 = vsub.f32 1.0, %v363_v0  ;;  %v381_v6 = vadd.f32 %v379_v1, %v337_v63 }
  0xd7   :  { %v326_v8 = vadd.f32 %v559_v48, %v325_v3 }
  0xd8   :  { %v365_v9 = vmul.f32 %v563_v59, %v364_v5  ;;  %383 = vst [vmem:[#allocation10] sm:$0xff] %v381_v6 }
  0xd9   :  { %v330_v13 = vsel %vm329_vm11, %v559_v48, %v326_v8 }
  0xda   :  { %v366_v14 = vadd.f32 %v563_v59, %v365_v9  ;;  %v335_v15 = vsel %vm332_vm12, %v334_v11, %v330_v13 }
  0xdb   :  { %v338_v18 = vmul.f32 %v335_v15, %v298_v12 }
  0xdc   :  { %v370_v17 = vsel %vm369_vm14, %v563_v59, %v366_v14 }
  0xdd   :  { %v375_v20 = vsel %vm372_vm15, %v374_v16, %v370_v17 }
  0xde   :  { %v380_v21 = vmul.f32 %v565_v19, %v375_v20 }
  0xe0   :  { %v382_v22 = vadd.f32 %v380_v21, %v338_v18 }
  0xe2   :  { %384 = vst [vmem:[#allocation10 + $0x8] sm:$0xff] %v382_v22 }
  0xe3   :  { %397 = dma.vmem_to_hbm [thread:$0]  %s390_s3, 256, %s392_s15, [#allocation4], %s702_s11, %s702_s11, %s703_s12  }
  0xe4   :  { %692 = dma.done.wait [#allocation4], 256  }
  0xe5   :  { %693 = vsyncadd [#allocation4], 4294967040 }
  0xe6   :  { %402 = vsyncpa [#allocation3], 1 }
  0xe7   :  { %403 = vsyncpa [#allocation6], 1 }
  0xe8   :  { %404 = vsyncpa [#allocation9], 1 }
  0xe9   :  { %405 = vsyncpa [#allocation4], 1 }

</bundles_post_ra>
